<compile_context>
chip_gen: v5e
topology: v5e:2x2
jax: 0.10.0
libtpu: 0.0.40
codegen_flags: <defaults>
</compile_context>

<pallas_src>
import jax
import jax.numpy as jnp
from jax.experimental import pallas as pl
from jax.experimental.pallas import tpu as pltpu

IN_FEATURES = 1024
OUT_FEATURES = 1


def _round_up(x, m):
    return ((x + m - 1) // m) * m


def _tpu_generation():
    """Best-effort TPU generation (4/5/6/7); 0 if unknown."""
    try:
        kind = jax.devices()[0].device_kind.lower()
    except Exception:
        return 0
    for gen in (7, 6, 5, 4):
        if (f"v{gen}" in kind) or (f"tpu{gen}" in kind):
            return gen
    return 0


def _discriminator_kernel(x_ref, w_ref, b_ref, o_ref):
    # x_ref: (tb, 1024) VMEM f32  (streamed per grid step; the ragged tail block
    #        may contain stale rows, whose outputs are masked on writeback and
    #        never read -> correctness preserved)
    # w_ref: (1, 1024)  VMEM f32  (constant index_map -> resident, no re-DMA)
    # b_ref: (1, 1)     SMEM f32  (scalar)
    # o_ref: (tb, 1)    VMEM f32
    prod = x_ref[...] * w_ref[...]                 # VPU broadcast-multiply
    acc = jnp.sum(prod, axis=-1, keepdims=True)    # XLU lane reduction -> (tb, 1)
    o_ref[...] = jax.nn.sigmoid(acc + b_ref[0, 0]).astype(o_ref.dtype)


def _choose_tile(batch, tb_max, min_tiles):
    """Rows per batch tile: multiple of 8, <= tb_max, and (when possible) enough
    tiles so `min_tiles` TensorCores all get work."""
    tb = min(tb_max, _round_up(batch, 8))
    if min_tiles > 1:
        tb = min(tb, _round_up(pl.cdiv(batch, min_tiles), 8))
    return max(8, tb)


def discriminator_forward(x, w, b, *, tb_max=None, min_tiles=None):
    """x: (B, 1024) f32, w: (1, 1024) f32, b: (1, 1) f32 -> (B, 1) f32."""
    B = x.shape[0]
    gen = _tpu_generation()
    if tb_max is None:
        # v5e (~820 GB/s): 1024-row tiles already amortize the ~0.35us/step
        # overhead.  v6e (1.4 TB/s) and v7x (3.2 TB/s) want bigger tiles.
        tb_max = {7: 4096, 6: 2048}.get(gen, 1024)
    if min_tiles is None:
        # v7x has 2 TensorCores per chip: make sure both get batch tiles.
        min_tiles = 2 if gen >= 7 else 1

    tb = _choose_tile(B, tb_max, min_tiles)
    n_tiles = pl.cdiv(B, tb)   # un-padded: Pallas masks the ragged last block

    # Double-buffered VMEM footprint: x tiles + lane-padded (tb,1) out tiles +
    # sublane-padded (1,1024) weight.  Raise the scoped-VMEM limit with headroom
    # (v7x@4096 needs ~40 MiB, still well under 64 MiB physical).
    vmem_bytes = (2 * tb * IN_FEATURES * 4
                  + 2 * tb * 128 * 4
                  + 2 * 8 * IN_FEATURES * 4)
    vmem_limit = int(max(32 << 20, vmem_bytes + (4 << 20)))

    out = pl.pallas_call(
        _discriminator_kernel,
        out_shape=jax.ShapeDtypeStruct((B, OUT_FEATURES), jnp.float32),
        grid_spec=pltpu.PrefetchScalarGridSpec(
            num_scalar_prefetch=0,
            grid=(n_tiles,),
            in_specs=[
                pl.BlockSpec((tb, IN_FEATURES), lambda i: (i, 0)),   # x tile
                pl.BlockSpec((1, IN_FEATURES), lambda i: (0, 0)),    # w resident
                pl.BlockSpec(memory_space=pltpu.MemorySpace.SMEM),   # bias scalar
            ],
            out_specs=pl.BlockSpec((tb, OUT_FEATURES), lambda i: (i, 0)),
        ),
        compiler_params=pltpu.CompilerParams(
            # Independent batch tiles -> shard across TensorCores on v7x.
            dimension_semantics=("parallel",),
            vmem_limit_bytes=vmem_limit,
        ),
    )(x, w, b)
    return out


def init_params(key):
    """Deterministic init matching the PyTorch module's __init__.

    Weight: xavier_uniform over (out=1, in=1024) -> bound = sqrt(6/(1+1024)).
    Bias:   PyTorch Linear default uniform(-1/sqrt(fan_in), 1/sqrt(fan_in)).
    """
    kw, kb = jax.random.split(key)
    bound_w = (6.0 / (IN_FEATURES + OUT_FEATURES)) ** 0.5
    w = jax.random.uniform(
        kw, (OUT_FEATURES, IN_FEATURES), jnp.float32, -bound_w, bound_w
    )
    bound_b = 1.0 / (IN_FEATURES ** 0.5)
    b = jax.random.uniform(
        kb, (1, OUT_FEATURES), jnp.float32, -bound_b, bound_b
    )
    return w, b  # (1, 1024), (1, 1)


if __name__ == "__main__":
    key = jax.random.PRNGKey(0)
    k_params, k_x1, k_x2 = jax.random.split(key, 3)

    w, b = init_params(k_params)

    # Small batch, not a multiple of the tile -> exercises the un-padded
    # ragged-tail path (masked writeback, no jnp.pad).
    B1 = 12
    x1 = jax.random.normal(k_x1, (B1, IN_FEATURES), jnp.float32)
    out1 = jax.block_until_ready(discriminator_forward(x1, w, b))
    ref1 = jax.nn.sigmoid(x1 @ w.T + b)
    assert out1.shape == (B1, OUT_FEATURES)
    assert jnp.allclose(out1, ref1, atol=1e-5, rtol=1e-4)

    # Multi-tile grid with a ragged last tile (tiny tile cap, coverage only).
    B2 = 20
    x2 = jax.random.normal(k_x2, (B2, IN_FEATURES), jnp.float32)
    out2 = jax.block_until_ready(
        discriminator_forward(x2, w, b, tb_max=8, min_tiles=1)
    )
    ref2 = jax.nn.sigmoid(x2 @ w.T + b)
    assert out2.shape == (B2, OUT_FEATURES)
    assert jnp.allclose(out2, ref2, atol=1e-5, rtol=1e-4)

    print("KERNEL_OK")
</pallas_src>

<mosaic_0001>
module attributes {stable_mosaic.version = 11 : i64} {
  func.func @_discriminator_kernel(%arg0: i32, %arg1: memref<16x1024xf32, #tpu.memory_space<vmem>>, %arg2: memref<1x1024xf32, #tpu.memory_space<vmem>>, %arg3: memref<1x1xf32, #tpu.memory_space<smem>>, %arg4: memref<16x1xf32, #tpu.memory_space<vmem>>) attributes {dimension_semantics = [#tpu.dimension_semantics<parallel>], iteration_bounds = array<i64: 1>, scalar_prefetch = 0 : i64, scratch_operands = 0 : i64, tpu.core_type = #tpu.core_type<tc>, window_params = [{transform_indices = @transform_0, window_bounds = array<i64: 16, 1024>}, {pipeline_mode = #tpu.pipeline_mode<synchronous>, transform_indices = @transform_1, window_bounds = array<i64: 1, 1024>}, {transform_indices = @transform_2, window_bounds = array<i64: 1, 1>}, {transform_indices = @transform_3, window_bounds = array<i64: 16, 1>}]} {
    %c0 = arith.constant 0 : index
    %c0_0 = arith.constant 0 : index
    %0 = vector.load %arg1[%c0, %c0_0] : memref<16x1024xf32, #tpu.memory_space<vmem>>, vector<16x1024xf32>
    %c0_1 = arith.constant 0 : index
    %c0_2 = arith.constant 0 : index
    %1 = vector.load %arg2[%c0_1, %c0_2] : memref<1x1024xf32, #tpu.memory_space<vmem>>, vector<1x1024xf32>
    %2 = vector.broadcast %1 : vector<1x1024xf32> to vector<16x1024xf32>
    %3 = arith.mulf %0, %2 : vector<16x1024xf32>
    %cst = arith.constant dense<0.000000e+00> : vector<16xf32>
    %4 = vector.multi_reduction <add>, %3, %cst [1] : vector<16x1024xf32> to vector<16xf32>
    %5 = vector.shape_cast %4 : vector<16xf32> to vector<16x1xf32>
    %c0_3 = arith.constant 0 : index
    %c0_4 = arith.constant 0 : index
    %6 = memref.load %arg3[%c0_3, %c0_4] : memref<1x1xf32, #tpu.memory_space<smem>>
    %7 = vector.broadcast %6 : f32 to vector<16x1xf32>
    %8 = arith.addf %5, %7 : vector<16x1xf32>
    %9 = arith.negf %8 : vector<16x1xf32>
    %10 = math.exp %9 : vector<16x1xf32>
    %cst_5 = arith.constant 1.000000e+00 : f32
    %11 = vector.broadcast %cst_5 : f32 to vector<16x1xf32>
    %12 = arith.addf %11, %10 : vector<16x1xf32>
    %13 = arith.divf %11, %12 : vector<16x1xf32>
    %c0_6 = arith.constant 0 : index
    %c0_7 = arith.constant 0 : index
    %14 = vector.load %arg4[%c0_6, %c0_7] : memref<16x1xf32, #tpu.memory_space<vmem>>, vector<16x1xf32>
    tpu.vector_store %arg4[%c0_6, %c0_7], %13 {strides = array<i32>} : memref<16x1xf32, #tpu.memory_space<vmem>>, vector<16x1xf32>,
    return
  }
  func.func @transform_0(%arg0: i32) -> (i32, i32) {
    %c0_i32 = arith.constant 0 : i32
    %c0_i32_0 = arith.constant 0 : i32
    return %arg0, %c0_i32 : i32, i32
  }
  func.func @transform_1(%arg0: i32) -> (i32, i32) {
    %c0_i32 = arith.constant 0 : i32
    %c0_i32_0 = arith.constant 0 : i32
    %c0_i32_1 = arith.constant 0 : i32
    return %c0_i32, %c0_i32_0 : i32, i32
  }
  func.func @transform_2(%arg0: i32) -> (i32, i32) {
    %c0_i32 = arith.constant 0 : i32
    %c0_i32_0 = arith.constant 0 : i32
    %c0_i32_1 = arith.constant 0 : i32
    return %c0_i32, %c0_i32_0 : i32, i32
  }
  func.func @transform_3(%arg0: i32) -> (i32, i32) {
    %c0_i32 = arith.constant 0 : i32
    %c0_i32_0 = arith.constant 0 : i32
    return %arg0, %c0_i32 : i32, i32
  }
}

</mosaic_0001>

<bundles_post_ra>
// kernel: tpu_custom_call.1
= control target key start
LH: loop header
LB: loop body
LE: loop exit
PB: predicated region body
PF: predicated region fallthrough
CT: control target
= control target key end

     0   :  { %9 = vsyncpa [#allocation4], 0  ;;  %s271_s0 = inlined_call_operand.hbm [shape: f32[12,1024], index: 0, kind: input, shape index: {}]   ;;  %s272_s1 = inlined_call_operand.hbm [shape: f32[1,1024], index: 1, kind: input, shape index: {}]   ;;  %s273_s2 = inlined_call_operand.<no memory space> [shape: f32[1,1], index: 2, kind: input, shape index: {}]   ;;  %s274_s3 = inlined_call_operand.vmem [shape: f32[12,1], index: 3, kind: output, shape index: {}]  }
   0x1   :  { %s15_s14 = sshll.u32 %s271_s0, 4  ;;  %s16_s14 = int_to_ptr.hbm [resolvable:$true] %s15_s14 }
   0x2   :  { %10 = vsyncpa [#allocation6], 0  ;;  %s230_s15 = smov [#allocation3]   ;;  %s29_s19 = sshll.u32 %s272_s1, 4  ;;  %s30_s19 = int_to_ptr.hbm [resolvable:$true] %s29_s19 }
   0x3   :  { %s17_s16 = sshll.u32 %s230_s15, 4  ;;  %s231_s20 = smov 1024   ;;  %s18_s16 = int_to_ptr.vmem [resolvable:$true] %s17_s16 }
   0x4   :  { %s232_s21 = smov 64   ;;  %s233_s22 = smov [#allocation5]  }
   0x5   :  { %23 = dma.hbm_to_vmem [thread:$0]  %s16_s14, 2048, %s18_s16, [#allocation4], %s231_s20, %s231_s20, %s232_s21  }
   0x6   :  { %s31_s23 = sshll.u32 %s233_s22, 4  ;;  %s32_s23 = int_to_ptr.vmem [resolvable:$true] %s31_s23 }
   0x7   :  { %34 = dma.hbm_to_vmem [thread:$0]  %s30_s19, 128, %s32_s23, [#allocation6]  }
   0x8   :  { %226 = dma.done.wait [#allocation4], 2048  }
   0x9   :  { %227 = vsyncadd [#allocation4], 4294965248 }
   0xa   :  { %228 = dma.done.wait [#allocation6], 128  }
   0xb   :  { %229 = vsyncadd [#allocation6], 4294967168  ;;  %v45_v0 = vld [vmem:[#allocation3] sm:$0xff]  ;;  %v46_v1 = vld [vmem:[#allocation3 + $0x8] sm:$0xff]  ;;  %v114_v55 = vstv %s273_s2  ;;  %vm155_vm2 = vcmask 7168  }
   0xc   :  { %v47_v2 = vld [vmem:[#allocation3 + $0x10] sm:$0xff]  ;;  %v61_v3 = vld [vmem:[#allocation5] sm:$0xff]  ;;  %v48_v4 = vld [vmem:[#allocation3 + $0x18] sm:$0xff] }
   0xd   :  { %v63_v5 = vperm.slane %v61_v3, 0  ;;  %v64_v6 = vperm.slane %v61_v3, 1  ;;  %v65_v7 = vperm.slane %v61_v3, 2  ;;  %v66_v8 = vperm.slane %v61_v3, 3  ;;  %v53_v9 = vld [vmem:[#allocation3 + $0x40] sm:$0xff]  ;;  %v54_v10 = vld [vmem:[#allocation3 + $0x48] sm:$0xff] }
   0xe   :  { %v55_v11 = vld [vmem:[#allocation3 + $0x50] sm:$0xff]  ;;  %v67_v12 = vperm.slane %v61_v3, 4  ;;  %v49_v16 = vld [vmem:[#allocation3 + $0x20] sm:$0xff]  ;;  %v68_v17 = vperm.slane %v61_v3, 5  ;;  %v56_v19 = vld [vmem:[#allocation3 + $0x58] sm:$0xff]  ;;  %v69_v25 = vperm.slane %v61_v3, 6 }
   0xf   :  { %v79_v13 = vmul.f32 %v63_v5, %v45_v0  ;;  %v80_v14 = vmul.f32 %v64_v6, %v46_v1  ;;  %v81_v15 = vmul.f32 %v65_v7, %v47_v2  ;;  %v82_v18 = vmul.f32 %v66_v8, %v48_v4  ;;  %v50_v24 = vld [vmem:[#allocation3 + $0x28] sm:$0xff]  ;;  %v57_v26 = vld [vmem:[#allocation3 + $0x60] sm:$0xff]  ;;  %v51_v31 = vld [vmem:[#allocation3 + $0x30] sm:$0xff] }
  0x10   :  { %v87_v21 = vmul.f32 %v63_v5, %v53_v9  ;;  %v88_v22 = vmul.f32 %v64_v6, %v54_v10  ;;  %v89_v23 = vmul.f32 %v65_v7, %v55_v11  ;;  %v83_v27 = vmul.f32 %v67_v12, %v49_v16  ;;  %v58_v33 = vld [vmem:[#allocation3 + $0x68] sm:$0xff]  ;;  %v52_v38 = vld [vmem:[#allocation3 + $0x38] sm:$0xff]  ;;  %v59_v43 = vld [vmem:[#allocation3 + $0x70] sm:$0xff] }
  0x11   :  { %v95_v20 = vadd.f32 %v80_v14, %v79_v13  ;;  %v90_v29 = vmul.f32 %v66_v8, %v56_v19  ;;  %v70_v32 = vperm.slane %v61_v3, 7  ;;  %v84_v34 = vmul.f32 %v68_v17, %v50_v24  ;;  %v60_v50 = vld [vmem:[#allocation3 + $0x78] sm:$0xff] }
  0x12   :  { %v104_v30 = vadd.f32 %v88_v22, %v87_v21  ;;  %v91_v36 = vmul.f32 %v67_v12, %v57_v26  ;;  %v85_v39 = vmul.f32 %v69_v25, %v51_v31  ;;  %v92_v41 = vmul.f32 %v68_v17, %v58_v33 }
  0x13   :  { %v96_v28 = vadd.f32 %v95_v20, %v81_v15  ;;  %v86_v44 = vmul.f32 %v70_v32, %v52_v38  ;;  %v93_v48 = vmul.f32 %v69_v25, %v59_v43  ;;  %v94_v52 = vmul.f32 %v70_v32, %v60_v50 }
  0x14   :  { %v105_v37 = vadd.f32 %v104_v30, %v89_v23 }
  0x15   :  { %v97_v35 = vadd.f32 %v96_v28, %v82_v18 }
  0x16   :  { %v106_v42 = vadd.f32 %v105_v37, %v90_v29 }
  0x17   :  { %v98_v40 = vadd.f32 %v97_v35, %v83_v27 }
  0x18   :  { %v107_v46 = vadd.f32 %v106_v42, %v91_v36 }
  0x19   :  { %v99_v45 = vadd.f32 %v98_v40, %v84_v34 }
  0x1a   :  { %v108_v49 = vadd.f32 %v107_v46, %v92_v41 }
  0x1b   :  { %v100_v47 = vadd.f32 %v99_v45, %v85_v39 }
  0x1c   :  { %v109_v53 = vadd.f32 %v108_v49, %v93_v48 }
  0x1d   :  { %v101_v51 = vadd.f32 %v100_v47, %v86_v44 }
  0x1e   :  { %v110_v54 = vadd.f32 %v109_v53, %v94_v52 }
  0x1f   :  { %102 = vadd.xlane.f32.xlu0 %v101_v51 }
  0x27   :  { %111 = vadd.xlane.f32.xlu0 %v110_v54 }
  0x92   :  { %v103_v56 = vpop.xlane.xlu0 %102 }
  0x93   :  { %v115_v57 = vadd.f32 %v114_v55, %v103_v56 }
  0x95   :  { %v164_v58 = vmul.f32 -1.442695, %v115_v57 }
  0x97   :  { %170 = vpow2.f32 %v164_v58 }
  0x9a   :  { %v112_v59 = vpop.xlane.xlu0 %111 }
  0x9b   :  { %v116_v60 = vadd.f32 %v114_v55, %v112_v59 }
  0x9d   :  { %v171_v61 = vpop.eup %170  ;;  %v165_v62 = vmul.f32 -1.442695, %v116_v60 }
  0x9e   :  { %v123_v63 = vadd.f32 1.0, %v171_v61 }
  0x9f   :  { %172 = vpow2.f32 %v165_v62 }
  0xa0   :  { %174 = vrcp.f32 %v123_v63  ;;  %v136_v5 = vand.u32 2147483648, %v123_v63  ;;  %v134_v7 = vand.u32 2147483647, %v123_v63  ;;  %vm130_vm1 = vweird.f32 %v123_v63 }
  0xa2   :  { %v137_v10 = vor.u32 1.1754944e-38, %v136_v5  ;;  %vm135_vm4 = vcmp.eq.f32.partialorder %v134_v7, 8.507059e+37 }
  0xa5   :  { %v173_v0 = vpop.eup %172 }
  0xa6   :  { %v175_v1 = vpop.eup %174  ;;  %v124_v2 = vadd.f32 1.0, %v173_v0 }
  0xa7   :  { %v126_v3 = vmul.f32 %v175_v1, %v123_v63  ;;  %vm131_vm0 = vweird.f32 %v175_v1 }
  0xa8   :  { %176 = vrcp.f32 %v124_v2  ;;  %vm132_vm3 = vmor %vm130_vm1, %vm131_vm0  ;;  %v151_v15 = vand.u32 2147483648, %v124_v2  ;;  %v149_v17 = vand.u32 2147483647, %v124_v2  ;;  %vm145_vm6 = vweird.f32 %v124_v2 }
  0xa9   :  { %v127_v4 = vsub.f32 1.0, %v126_v3 }
  0xaa   :  { %v152_v19 = vor.u32 1.1754944e-38, %v151_v15  ;;  %vm150_vm8 = vcmp.eq.f32.partialorder %v149_v17, 8.507059e+37 }
  0xab   :  { %v128_v6 = vmul.f32 %v175_v1, %v127_v4 }
  0xad   :  { %v129_v8 = vadd.f32 %v175_v1, %v128_v6 }
  0xae   :  { %v177_v9 = vpop.eup %176 }
  0xaf   :  { %v133_v11 = vsel %vm132_vm3, %v175_v1, %v129_v8  ;;  %v141_v12 = vmul.f32 %v177_v9, %v124_v2  ;;  %vm146_vm5 = vweird.f32 %v177_v9 }
  0xb0   :  { %v138_v13 = vsel %vm135_vm4, %v137_v10, %v133_v11  ;;  %vm147_vm7 = vmor %vm145_vm6, %vm146_vm5 }
  0xb1   :  { %156 = vst.msk [vmem:[%s274_s3] sm:$0xff] %vm155_vm2, %v138_v13  ;;  %v142_v14 = vsub.f32 1.0, %v141_v12 }
  0xb3   :  { %v143_v16 = vmul.f32 %v177_v9, %v142_v14 }
  0xb5   :  { %v144_v18 = vadd.f32 %v177_v9, %v143_v16 }
  0xb7   :  { %v148_v20 = vsel %vm147_vm7, %v177_v9, %v144_v18 }
  0xb8   :  { %v153_v21 = vsel %vm150_vm8, %v152_v19, %v148_v20 }
  0xb9   :  { %157 = vst.msk [vmem:[%s274_s3 + $0x8] sm:$0xff] %vm155_vm2, %v153_v21 }
  0xba   :  { %162 = vsyncpa [#allocation4], 1 }
  0xbb   :  { %163 = vsyncpa [#allocation6], 1 }

</bundles_post_ra>
